<compile_context>
chip_gen: v5e
topology: v5e:2x2
jax: 0.10.0
libtpu: 0.0.40
codegen_flags: <defaults>
</compile_context>

<pallas_src>
import jax
import jax.numpy as jnp
from jax import lax
from jax.experimental import pallas as pl
from jax.experimental.pallas import tpu as pltpu

_LANE = 128
_SUBLANE = 8


def _round_up(x, m):
    return pl.cdiv(x, m) * m


def _make_rnn_kernel(num_layers, seq_len, batch_tile, hid_pad):
    """Builds the Pallas kernel body for static num_layers / seq_len."""
    unroll = min(seq_len, 8)

    def kernel(*refs):
        # refs layout:
        #   x_ref                                   (seq*Bt, IN_pad)   bf16
        #   per layer: w_ih, w_hh, bias             (in_l, H), (H, H) bf16, (1, H) f32
        #   fc_w, fc_b                              (H, OUT_pad) bf16, (1, OUT_pad) f32
        #   out_ref                                 (Bt, OUT_pad)      f32
        #   hseq_ref (scratch)                      (seq*Bt, H)        f32
        x_ref = refs[0]
        layer_refs = refs[1:1 + 3 * num_layers]
        fc_w_ref = refs[1 + 3 * num_layers]
        fc_b_ref = refs[2 + 3 * num_layers]
        out_ref = refs[3 + 3 * num_layers]
        hseq_ref = refs[4 + 3 * num_layers]

        h_last = None
        for l in range(num_layers):
            w_ih = layer_refs[3 * l][...]        # bf16 (in_l_pad, hid_pad)
            w_hh = layer_refs[3 * l + 1][...]    # bf16 (hid_pad, hid_pad)
            bias = layer_refs[3 * l + 2][...]    # f32  (1, hid_pad)

            # Input projection for ALL timesteps as one big MXU GEMM,
            # with the (b_ih + b_hh) bias folded into its epilogue.
            inp = x_ref[...] if l == 0 else hseq_ref[...].astype(jnp.bfloat16)
            hseq_ref[...] = (
                jnp.dot(inp, w_ih, preferred_element_type=jnp.float32) + bias)

            store = (l != num_layers - 1)

            # Serial recurrence: h_t = relu(xproj[t] + h_{t-1} @ W_hh).
            def step(t, h, *, w_hh=w_hh, store=store):
                row = pl.multiple_of(t * batch_tile, batch_tile)
                h_new = jnp.maximum(
                    hseq_ref[pl.ds(row, batch_tile), :]
                    + jnp.dot(h.astype(jnp.bfloat16), w_hh,
                              preferred_element_type=jnp.float32),
                    0.0)
                if store:
                    # Becomes the next layer's input at timestep t.
                    hseq_ref[pl.ds(row, batch_tile), :] = h_new
                return h_new

            h_last = lax.fori_loop(
                0, seq_len, step,
                jnp.zeros((batch_tile, hid_pad), jnp.float32),
                unroll=unroll)

        # fc on the last time step's hidden state of the last layer.
        out_ref[...] = (
            jnp.dot(h_last.astype(jnp.bfloat16), fc_w_ref[...],
                    preferred_element_type=jnp.float32)
            + fc_b_ref[...])

    return kernel


def rnn_pallas(x, params, *, num_layers, hidden_size, output_size):
    batch, seq, input_size = x.shape
    in_pad = _round_up(input_size, _LANE)
    hid_pad = _round_up(hidden_size, _LANE)
    out_pad = _round_up(output_size, _LANE)

    # Batch tiling: up to 128 rows per tile to feed the MXU; if the padded
    # batch allows, split into >= 2 grid programs (v7x has 2 TensorCores).
    b_pad0 = _round_up(batch, _SUBLANE)
    if b_pad0 > _SUBLANE:
        b_tile = min(128, _round_up(pl.cdiv(b_pad0, 2), _SUBLANE))
    else:
        b_tile = _SUBLANE
    b_pad = _round_up(b_pad0, b_tile)
    nb = b_pad // b_tile
    grid = (nb,)

    # x -> time-major, zero-padded, regrouped per batch tile as a 2D slab
    # (rows ordered (t, local_batch)), cast to bf16 for the MXU.
    x_tm = jnp.transpose(x, (1, 0, 2)).astype(jnp.float32)
    x_tm = jnp.pad(x_tm, ((0, 0), (0, b_pad - batch), (0, in_pad - input_size)))
    x_blk = (x_tm.reshape(seq, nb, b_tile, in_pad)
                 .transpose(1, 0, 2, 3)
                 .reshape(nb, seq * b_tile, in_pad)
                 .astype(jnp.bfloat16))

    flat_inputs = [x_blk]
    in_specs = [pl.BlockSpec((None, seq * b_tile, in_pad),
                             lambda bi: (bi, 0, 0))]

    for l in range(num_layers):
        w_ih, w_hh, b_ih, b_hh = params[f"layer{l}"]
        in_dim = w_ih.shape[1]
        layer_in_pad = in_pad if l == 0 else hid_pad
        # Pre-transpose to (in, out); zero-pad; bf16 weights, f32 bias.
        w_ih_p = jnp.zeros((layer_in_pad, hid_pad), jnp.float32)
        w_ih_p = w_ih_p.at[:in_dim, :hidden_size].set(w_ih.T).astype(jnp.bfloat16)
        w_hh_p = jnp.zeros((hid_pad, hid_pad), jnp.float32)
        w_hh_p = w_hh_p.at[:hidden_size, :hidden_size].set(w_hh.T).astype(jnp.bfloat16)
        bias_p = jnp.zeros((1, hid_pad), jnp.float32)
        bias_p = bias_p.at[0, :hidden_size].set(b_ih + b_hh)
        flat_inputs += [w_ih_p, w_hh_p, bias_p]
        in_specs += [
            pl.BlockSpec((layer_in_pad, hid_pad), lambda bi: (0, 0)),
            pl.BlockSpec((hid_pad, hid_pad), lambda bi: (0, 0)),
            pl.BlockSpec((1, hid_pad), lambda bi: (0, 0)),
        ]

    fc_w, fc_b = params["fc"]
    fc_w_p = jnp.zeros((hid_pad, out_pad), jnp.float32)
    fc_w_p = fc_w_p.at[:hidden_size, :output_size].set(fc_w.T).astype(jnp.bfloat16)
    fc_b_p = jnp.zeros((1, out_pad), jnp.float32)
    fc_b_p = fc_b_p.at[0, :output_size].set(fc_b)
    flat_inputs += [fc_w_p, fc_b_p]
    in_specs += [
        pl.BlockSpec((hid_pad, out_pad), lambda bi: (0, 0)),
        pl.BlockSpec((1, out_pad), lambda bi: (0, 0)),
    ]

    # Rough VMEM budget (double-buffered inputs/outputs + scratch), with
    # headroom; keeps v5e (16 MiB default scoped VMEM) from under-provisioning.
    est = (2 * seq * b_tile * in_pad * 2          # x block (bf16, 2 bufs)
           + seq * b_tile * hid_pad * 4           # hseq scratch (f32)
           + 2 * b_tile * out_pad * 4)            # out block (f32, 2 bufs)
    for l in range(num_layers):
        lin = in_pad if l == 0 else hid_pad
        est += 2 * (lin * hid_pad + hid_pad * hid_pad) * 2 + 2 * hid_pad * 4
    est += 2 * hid_pad * out_pad * 2 + 2 * out_pad * 4
    vmem_limit = int(min(max(2 * est, 32 * 1024 * 1024), 64 * 1024 * 1024))

    kernel = _make_rnn_kernel(num_layers, seq, b_tile, hid_pad)
    out_padded = pl.pallas_call(
        kernel,
        out_shape=jax.ShapeDtypeStruct((b_pad, out_pad), jnp.float32),
        grid=grid,
        in_specs=in_specs,
        out_specs=pl.BlockSpec((b_tile, out_pad), lambda bi: (bi, 0)),
        scratch_shapes=[pltpu.VMEM((seq * b_tile, hid_pad), jnp.float32)],
        compiler_params=pltpu.CompilerParams(
            dimension_semantics=("parallel",),
            vmem_limit_bytes=vmem_limit),
    )(*flat_inputs)

    # Strip sublane/lane padding.
    return out_padded[:batch, :output_size]


def rnn_reference(x, params, *, num_layers):
    """Pure-JAX f32 reference matching torch.nn.RNN(relu, batch_first) + Linear."""
    batch, seq, _ = x.shape
    inp = x
    for l in range(num_layers):
        w_ih, w_hh, b_ih, b_hh = params[f"layer{l}"]
        h = jnp.zeros((batch, w_hh.shape[0]), jnp.float32)
        outs = []
        for t in range(seq):
            h = jax.nn.relu(inp[:, t, :] @ w_ih.T + b_ih + h @ w_hh.T + b_hh)
            outs.append(h)
        inp = jnp.stack(outs, axis=1)
    fc_w, fc_b = params["fc"]
    return inp[:, -1, :] @ fc_w.T + fc_b


def init_params(key, input_size, hidden_size, num_layers, output_size):
    """Deterministic init mimicking PyTorch's U(-1/sqrt(H), 1/sqrt(H))."""
    k = 1.0 / jnp.sqrt(jnp.float32(hidden_size))
    params = {}
    for l in range(num_layers):
        in_dim = input_size if l == 0 else hidden_size
        key, k1, k2, k3, k4 = jax.random.split(key, 5)
        params[f"layer{l}"] = (
            jax.random.uniform(k1, (hidden_size, in_dim), jnp.float32, -k, k),
            jax.random.uniform(k2, (hidden_size, hidden_size), jnp.float32, -k, k),
            jax.random.uniform(k3, (hidden_size,), jnp.float32, -k, k),
            jax.random.uniform(k4, (hidden_size,), jnp.float32, -k, k),
        )
    key, k1, k2 = jax.random.split(key, 3)
    params["fc"] = (
        jax.random.uniform(k1, (output_size, hidden_size), jnp.float32, -k, k),
        jax.random.uniform(k2, (output_size,), jnp.float32, -k, k),
    )
    return params


if __name__ == "__main__":
    input_size, hidden_size, num_layers, output_size = 16, 32, 2, 8
    batch, seq = 2, 8

    key = jax.random.PRNGKey(0)
    key, kx = jax.random.split(key)
    x = jax.random.normal(kx, (batch, seq, input_size), jnp.float32)
    params = init_params(key, input_size, hidden_size, num_layers, output_size)

    out = rnn_pallas(x, params, num_layers=num_layers,
                     hidden_size=hidden_size, output_size=output_size)
    out = jax.block_until_ready(out)

    ref = rnn_reference(x, params, num_layers=num_layers)
    assert out.shape == (batch, output_size)
    # bf16 matmul operands (f32 accumulation) -> slightly looser tolerance
    # than the pure-f32 reference.
    assert jnp.allclose(out, ref, atol=3e-2, rtol=3e-2), "mismatch vs reference"

    print("KERNEL_OK")
</pallas_src>

<mosaic_0001>
module attributes {stable_mosaic.version = 11 : i64} {
  func.func @kernel(%arg0: i32, %arg1: memref<1x64x128xbf16, #tpu.memory_space<vmem>>, %arg2: memref<128x128xbf16, #tpu.memory_space<vmem>>, %arg3: memref<128x128xbf16, #tpu.memory_space<vmem>>, %arg4: memref<1x128xf32, #tpu.memory_space<vmem>>, %arg5: memref<128x128xbf16, #tpu.memory_space<vmem>>, %arg6: memref<128x128xbf16, #tpu.memory_space<vmem>>, %arg7: memref<1x128xf32, #tpu.memory_space<vmem>>, %arg8: memref<128x128xbf16, #tpu.memory_space<vmem>>, %arg9: memref<1x128xf32, #tpu.memory_space<vmem>>, %arg10: memref<8x128xf32, #tpu.memory_space<vmem>>, %arg11: memref<64x128xf32, #tpu.memory_space<vmem>>) attributes {dimension_semantics = [#tpu.dimension_semantics<parallel>], iteration_bounds = array<i64: 1>, scalar_prefetch = 0 : i64, scratch_operands = 1 : i64, tpu.core_type = #tpu.core_type<tc>, window_params = [{transform_indices = @transform_0, window_bounds = array<i64: 1, 64, 128>}, {pipeline_mode = #tpu.pipeline_mode<synchronous>, transform_indices = @transform_1, window_bounds = array<i64: 128, 128>}, {pipeline_mode = #tpu.pipeline_mode<synchronous>, transform_indices = @transform_2, window_bounds = array<i64: 128, 128>}, {pipeline_mode = #tpu.pipeline_mode<synchronous>, transform_indices = @transform_3, window_bounds = array<i64: 1, 128>}, {pipeline_mode = #tpu.pipeline_mode<synchronous>, transform_indices = @transform_4, window_bounds = array<i64: 128, 128>}, {pipeline_mode = #tpu.pipeline_mode<synchronous>, transform_indices = @transform_5, window_bounds = array<i64: 128, 128>}, {pipeline_mode = #tpu.pipeline_mode<synchronous>, transform_indices = @transform_6, window_bounds = array<i64: 1, 128>}, {pipeline_mode = #tpu.pipeline_mode<synchronous>, transform_indices = @transform_7, window_bounds = array<i64: 128, 128>}, {pipeline_mode = #tpu.pipeline_mode<synchronous>, transform_indices = @transform_8, window_bounds = array<i64: 1, 128>}, {transform_indices = @transform_9, window_bounds = array<i64: 8, 128>}]} {
    %c0 = arith.constant 0 : index
    %c0_0 = arith.constant 0 : index
    %0 = vector.load %arg2[%c0, %c0_0] : memref<128x128xbf16, #tpu.memory_space<vmem>>, vector<128x128xbf16>
    %c0_1 = arith.constant 0 : index
    %c0_2 = arith.constant 0 : index
    %1 = vector.load %arg3[%c0_1, %c0_2] : memref<128x128xbf16, #tpu.memory_space<vmem>>, vector<128x128xbf16>
    %c0_3 = arith.constant 0 : index
    %c0_4 = arith.constant 0 : index
    %2 = vector.load %arg4[%c0_3, %c0_4] : memref<1x128xf32, #tpu.memory_space<vmem>>, vector<1x128xf32>
    %c0_5 = arith.constant 0 : index
    %c0_6 = arith.constant 0 : index
    %c0_7 = arith.constant 0 : index
    %3 = vector.load %arg1[%c0_5, %c0_6, %c0_7] : memref<1x64x128xbf16, #tpu.memory_space<vmem>>, vector<1x64x128xbf16>
    %4 = vector.shape_cast %3 : vector<1x64x128xbf16> to vector<64x128xbf16>
    %cst = arith.constant dense<0.000000e+00> : vector<64x128xf32>
    %5 = tpu.matmul %4, %0, %cst {dimension_numbers = #tpu.dot_dimension_numbers<[1], [0], [0], [1], [0, 0, 1, 1], [], []>} : vector<64x128xbf16>, vector<128x128xbf16>, vector<64x128xf32> -> vector<64x128xf32>
    %6 = vector.broadcast %2 : vector<1x128xf32> to vector<64x128xf32>
    %7 = arith.addf %5, %6 : vector<64x128xf32>
    %c0_8 = arith.constant 0 : index
    %c0_9 = arith.constant 0 : index
    %8 = vector.load %arg11[%c0_8, %c0_9] : memref<64x128xf32, #tpu.memory_space<vmem>>, vector<64x128xf32>
    tpu.vector_store %arg11[%c0_8, %c0_9], %7 {strides = array<i32>} : memref<64x128xf32, #tpu.memory_space<vmem>>, vector<64x128xf32>,
    %cst_10 = arith.constant 0.000000e+00 : f32
    %9 = vector.broadcast %cst_10 : f32 to vector<8x128xf32>
    %c0_i32 = arith.constant 0 : i32
    %c8_i32 = arith.constant 8 : i32
    %10 = arith.muli %c0_i32, %c8_i32 : i32
    %11 = tpu.assume_multiple %10, 8 : i32
    %12 = arith.index_cast %11 : i32 to index
    %c0_11 = arith.constant 0 : index
    %13 = vector.load %arg11[%12, %c0_11] : memref<64x128xf32, #tpu.memory_space<vmem>>, vector<8x128xf32>
    %14 = arith.truncf %9 : vector<8x128xf32> to vector<8x128xbf16>
    %cst_12 = arith.constant dense<0.000000e+00> : vector<8x128xf32>
    %15 = tpu.matmul %14, %1, %cst_12 {dimension_numbers = #tpu.dot_dimension_numbers<[1], [0], [0], [1], [0, 0, 1, 1], [], []>} : vector<8x128xbf16>, vector<128x128xbf16>, vector<8x128xf32> -> vector<8x128xf32>
    %16 = arith.addf %13, %15 : vector<8x128xf32>
    %cst_13 = arith.constant 0.000000e+00 : f32
    %17 = vector.broadcast %cst_13 : f32 to vector<8x128xf32>
    %18 = arith.maximumf %16, %17 : vector<8x128xf32>
    %19 = arith.index_cast %11 : i32 to index
    %c0_14 = arith.constant 0 : index
    %20 = vector.load %arg11[%19, %c0_14] : memref<64x128xf32, #tpu.memory_space<vmem>>, vector<8x128xf32>
    tpu.vector_store %arg11[%19, %c0_14], %18 {strides = array<i32>} : memref<64x128xf32, #tpu.memory_space<vmem>>, vector<8x128xf32>,
    %c1_i32 = arith.constant 1 : i32
    %c8_i32_15 = arith.constant 8 : i32
    %21 = arith.muli %c1_i32, %c8_i32_15 : i32
    %22 = tpu.assume_multiple %21, 8 : i32
    %23 = arith.index_cast %22 : i32 to index
    %c0_16 = arith.constant 0 : index
    %24 = vector.load %arg11[%23, %c0_16] : memref<64x128xf32, #tpu.memory_space<vmem>>, vector<8x128xf32>
    %25 = arith.truncf %18 : vector<8x128xf32> to vector<8x128xbf16>
    %cst_17 = arith.constant dense<0.000000e+00> : vector<8x128xf32>
    %26 = tpu.matmul %25, %1, %cst_17 {dimension_numbers = #tpu.dot_dimension_numbers<[1], [0], [0], [1], [0, 0, 1, 1], [], []>} : vector<8x128xbf16>, vector<128x128xbf16>, vector<8x128xf32> -> vector<8x128xf32>
    %27 = arith.addf %24, %26 : vector<8x128xf32>
    %cst_18 = arith.constant 0.000000e+00 : f32
    %28 = vector.broadcast %cst_18 : f32 to vector<8x128xf32>
    %29 = arith.maximumf %27, %28 : vector<8x128xf32>
    %30 = arith.index_cast %22 : i32 to index
    %c0_19 = arith.constant 0 : index
    %31 = vector.load %arg11[%30, %c0_19] : memref<64x128xf32, #tpu.memory_space<vmem>>, vector<8x128xf32>
    tpu.vector_store %arg11[%30, %c0_19], %29 {strides = array<i32>} : memref<64x128xf32, #tpu.memory_space<vmem>>, vector<8x128xf32>,
    %c2_i32 = arith.constant 2 : i32
    %c8_i32_20 = arith.constant 8 : i32
    %32 = arith.muli %c2_i32, %c8_i32_20 : i32
    %33 = tpu.assume_multiple %32, 8 : i32
    %34 = arith.index_cast %33 : i32 to index
    %c0_21 = arith.constant 0 : index
    %35 = vector.load %arg11[%34, %c0_21] : memref<64x128xf32, #tpu.memory_space<vmem>>, vector<8x128xf32>
    %36 = arith.truncf %29 : vector<8x128xf32> to vector<8x128xbf16>
    %cst_22 = arith.constant dense<0.000000e+00> : vector<8x128xf32>
    %37 = tpu.matmul %36, %1, %cst_22 {dimension_numbers = #tpu.dot_dimension_numbers<[1], [0], [0], [1], [0, 0, 1, 1], [], []>} : vector<8x128xbf16>, vector<128x128xbf16>, vector<8x128xf32> -> vector<8x128xf32>
    %38 = arith.addf %35, %37 : vector<8x128xf32>
    %cst_23 = arith.constant 0.000000e+00 : f32
    %39 = vector.broadcast %cst_23 : f32 to vector<8x128xf32>
    %40 = arith.maximumf %38, %39 : vector<8x128xf32>
    %41 = arith.index_cast %33 : i32 to index
    %c0_24 = arith.constant 0 : index
    %42 = vector.load %arg11[%41, %c0_24] : memref<64x128xf32, #tpu.memory_space<vmem>>, vector<8x128xf32>
    tpu.vector_store %arg11[%41, %c0_24], %40 {strides = array<i32>} : memref<64x128xf32, #tpu.memory_space<vmem>>, vector<8x128xf32>,
    %c3_i32 = arith.constant 3 : i32
    %c8_i32_25 = arith.constant 8 : i32
    %43 = arith.muli %c3_i32, %c8_i32_25 : i32
    %44 = tpu.assume_multiple %43, 8 : i32
    %45 = arith.index_cast %44 : i32 to index
    %c0_26 = arith.constant 0 : index
    %46 = vector.load %arg11[%45, %c0_26] : memref<64x128xf32, #tpu.memory_space<vmem>>, vector<8x128xf32>
    %47 = arith.truncf %40 : vector<8x128xf32> to vector<8x128xbf16>
    %cst_27 = arith.constant dense<0.000000e+00> : vector<8x128xf32>
    %48 = tpu.matmul %47, %1, %cst_27 {dimension_numbers = #tpu.dot_dimension_numbers<[1], [0], [0], [1], [0, 0, 1, 1], [], []>} : vector<8x128xbf16>, vector<128x128xbf16>, vector<8x128xf32> -> vector<8x128xf32>
    %49 = arith.addf %46, %48 : vector<8x128xf32>
    %cst_28 = arith.constant 0.000000e+00 : f32
    %50 = vector.broadcast %cst_28 : f32 to vector<8x128xf32>
    %51 = arith.maximumf %49, %50 : vector<8x128xf32>
    %52 = arith.index_cast %44 : i32 to index
    %c0_29 = arith.constant 0 : index
    %53 = vector.load %arg11[%52, %c0_29] : memref<64x128xf32, #tpu.memory_space<vmem>>, vector<8x128xf32>
    tpu.vector_store %arg11[%52, %c0_29], %51 {strides = array<i32>} : memref<64x128xf32, #tpu.memory_space<vmem>>, vector<8x128xf32>,
    %c4_i32 = arith.constant 4 : i32
    %c8_i32_30 = arith.constant 8 : i32
    %54 = arith.muli %c4_i32, %c8_i32_30 : i32
    %55 = tpu.assume_multiple %54, 8 : i32
    %56 = arith.index_cast %55 : i32 to index
    %c0_31 = arith.constant 0 : index
    %57 = vector.load %arg11[%56, %c0_31] : memref<64x128xf32, #tpu.memory_space<vmem>>, vector<8x128xf32>
    %58 = arith.truncf %51 : vector<8x128xf32> to vector<8x128xbf16>
    %cst_32 = arith.constant dense<0.000000e+00> : vector<8x128xf32>
    %59 = tpu.matmul %58, %1, %cst_32 {dimension_numbers = #tpu.dot_dimension_numbers<[1], [0], [0], [1], [0, 0, 1, 1], [], []>} : vector<8x128xbf16>, vector<128x128xbf16>, vector<8x128xf32> -> vector<8x128xf32>
    %60 = arith.addf %57, %59 : vector<8x128xf32>
    %cst_33 = arith.constant 0.000000e+00 : f32
    %61 = vector.broadcast %cst_33 : f32 to vector<8x128xf32>
    %62 = arith.maximumf %60, %61 : vector<8x128xf32>
    %63 = arith.index_cast %55 : i32 to index
    %c0_34 = arith.constant 0 : index
    %64 = vector.load %arg11[%63, %c0_34] : memref<64x128xf32, #tpu.memory_space<vmem>>, vector<8x128xf32>
    tpu.vector_store %arg11[%63, %c0_34], %62 {strides = array<i32>} : memref<64x128xf32, #tpu.memory_space<vmem>>, vector<8x128xf32>,
    %c5_i32 = arith.constant 5 : i32
    %c8_i32_35 = arith.constant 8 : i32
    %65 = arith.muli %c5_i32, %c8_i32_35 : i32
    %66 = tpu.assume_multiple %65, 8 : i32
    %67 = arith.index_cast %66 : i32 to index
    %c0_36 = arith.constant 0 : index
    %68 = vector.load %arg11[%67, %c0_36] : memref<64x128xf32, #tpu.memory_space<vmem>>, vector<8x128xf32>
    %69 = arith.truncf %62 : vector<8x128xf32> to vector<8x128xbf16>
    %cst_37 = arith.constant dense<0.000000e+00> : vector<8x128xf32>
    %70 = tpu.matmul %69, %1, %cst_37 {dimension_numbers = #tpu.dot_dimension_numbers<[1], [0], [0], [1], [0, 0, 1, 1], [], []>} : vector<8x128xbf16>, vector<128x128xbf16>, vector<8x128xf32> -> vector<8x128xf32>
    %71 = arith.addf %68, %70 : vector<8x128xf32>
    %cst_38 = arith.constant 0.000000e+00 : f32
    %72 = vector.broadcast %cst_38 : f32 to vector<8x128xf32>
    %73 = arith.maximumf %71, %72 : vector<8x128xf32>
    %74 = arith.index_cast %66 : i32 to index
    %c0_39 = arith.constant 0 : index
    %75 = vector.load %arg11[%74, %c0_39] : memref<64x128xf32, #tpu.memory_space<vmem>>, vector<8x128xf32>
    tpu.vector_store %arg11[%74, %c0_39], %73 {strides = array<i32>} : memref<64x128xf32, #tpu.memory_space<vmem>>, vector<8x128xf32>,
    %c6_i32 = arith.constant 6 : i32
    %c8_i32_40 = arith.constant 8 : i32
    %76 = arith.muli %c6_i32, %c8_i32_40 : i32
    %77 = tpu.assume_multiple %76, 8 : i32
    %78 = arith.index_cast %77 : i32 to index
    %c0_41 = arith.constant 0 : index
    %79 = vector.load %arg11[%78, %c0_41] : memref<64x128xf32, #tpu.memory_space<vmem>>, vector<8x128xf32>
    %80 = arith.truncf %73 : vector<8x128xf32> to vector<8x128xbf16>
    %cst_42 = arith.constant dense<0.000000e+00> : vector<8x128xf32>
    %81 = tpu.matmul %80, %1, %cst_42 {dimension_numbers = #tpu.dot_dimension_numbers<[1], [0], [0], [1], [0, 0, 1, 1], [], []>} : vector<8x128xbf16>, vector<128x128xbf16>, vector<8x128xf32> -> vector<8x128xf32>
    %82 = arith.addf %79, %81 : vector<8x128xf32>
    %cst_43 = arith.constant 0.000000e+00 : f32
    %83 = vector.broadcast %cst_43 : f32 to vector<8x128xf32>
    %84 = arith.maximumf %82, %83 : vector<8x128xf32>
    %85 = arith.index_cast %77 : i32 to index
    %c0_44 = arith.constant 0 : index
    %86 = vector.load %arg11[%85, %c0_44] : memref<64x128xf32, #tpu.memory_space<vmem>>, vector<8x128xf32>
    tpu.vector_store %arg11[%85, %c0_44], %84 {strides = array<i32>} : memref<64x128xf32, #tpu.memory_space<vmem>>, vector<8x128xf32>,
    %c7_i32 = arith.constant 7 : i32
    %c8_i32_45 = arith.constant 8 : i32
    %87 = arith.muli %c7_i32, %c8_i32_45 : i32
    %88 = tpu.assume_multiple %87, 8 : i32
    %89 = arith.index_cast %88 : i32 to index
    %c0_46 = arith.constant 0 : index
    %90 = vector.load %arg11[%89, %c0_46] : memref<64x128xf32, #tpu.memory_space<vmem>>, vector<8x128xf32>
    %91 = arith.truncf %84 : vector<8x128xf32> to vector<8x128xbf16>
    %cst_47 = arith.constant dense<0.000000e+00> : vector<8x128xf32>
    %92 = tpu.matmul %91, %1, %cst_47 {dimension_numbers = #tpu.dot_dimension_numbers<[1], [0], [0], [1], [0, 0, 1, 1], [], []>} : vector<8x128xbf16>, vector<128x128xbf16>, vector<8x128xf32> -> vector<8x128xf32>
    %93 = arith.addf %90, %92 : vector<8x128xf32>
    %cst_48 = arith.constant 0.000000e+00 : f32
    %94 = vector.broadcast %cst_48 : f32 to vector<8x128xf32>
    %95 = arith.maximumf %93, %94 : vector<8x128xf32>
    %96 = arith.index_cast %88 : i32 to index
    %c0_49 = arith.constant 0 : index
    %97 = vector.load %arg11[%96, %c0_49] : memref<64x128xf32, #tpu.memory_space<vmem>>, vector<8x128xf32>
    tpu.vector_store %arg11[%96, %c0_49], %95 {strides = array<i32>} : memref<64x128xf32, #tpu.memory_space<vmem>>, vector<8x128xf32>,
    %c8_i32_50 = arith.constant 8 : i32
    %c0_51 = arith.constant 0 : index
    %c0_52 = arith.constant 0 : index
    %98 = vector.load %arg5[%c0_51, %c0_52] : memref<128x128xbf16, #tpu.memory_space<vmem>>, vector<128x128xbf16>
    %c0_53 = arith.constant 0 : index
    %c0_54 = arith.constant 0 : index
    %99 = vector.load %arg6[%c0_53, %c0_54] : memref<128x128xbf16, #tpu.memory_space<vmem>>, vector<128x128xbf16>
    %c0_55 = arith.constant 0 : index
    %c0_56 = arith.constant 0 : index
    %100 = vector.load %arg7[%c0_55, %c0_56] : memref<1x128xf32, #tpu.memory_space<vmem>>, vector<1x128xf32>
    %c0_57 = arith.constant 0 : index
    %c0_58 = arith.constant 0 : index
    %101 = vector.load %arg11[%c0_57, %c0_58] : memref<64x128xf32, #tpu.memory_space<vmem>>, vector<64x128xf32>
    %102 = arith.truncf %101 : vector<64x128xf32> to vector<64x128xbf16>
    %cst_59 = arith.constant dense<0.000000e+00> : vector<64x128xf32>
    %103 = tpu.matmul %102, %98, %cst_59 {dimension_numbers = #tpu.dot_dimension_numbers<[1], [0], [0], [1], [0, 0, 1, 1], [], []>} : vector<64x128xbf16>, vector<128x128xbf16>, vector<64x128xf32> -> vector<64x128xf32>
    %104 = vector.broadcast %100 : vector<1x128xf32> to vector<64x128xf32>
    %105 = arith.addf %103, %104 : vector<64x128xf32>
    %c0_60 = arith.constant 0 : index
    %c0_61 = arith.constant 0 : index
    %106 = vector.load %arg11[%c0_60, %c0_61] : memref<64x128xf32, #tpu.memory_space<vmem>>, vector<64x128xf32>
    tpu.vector_store %arg11[%c0_60, %c0_61], %105 {strides = array<i32>} : memref<64x128xf32, #tpu.memory_space<vmem>>, vector<64x128xf32>,
    %cst_62 = arith.constant 0.000000e+00 : f32
    %107 = vector.broadcast %cst_62 : f32 to vector<8x128xf32>
    %c0_i32_63 = arith.constant 0 : i32
    %c8_i32_64 = arith.constant 8 : i32
    %108 = arith.muli %c0_i32_63, %c8_i32_64 : i32
    %109 = tpu.assume_multiple %108, 8 : i32
    %110 = arith.index_cast %109 : i32 to index
    %c0_65 = arith.constant 0 : index
    %111 = vector.load %arg11[%110, %c0_65] : memref<64x128xf32, #tpu.memory_space<vmem>>, vector<8x128xf32>
    %112 = arith.truncf %107 : vector<8x128xf32> to vector<8x128xbf16>
    %cst_66 = arith.constant dense<0.000000e+00> : vector<8x128xf32>
    %113 = tpu.matmul %112, %99, %cst_66 {dimension_numbers = #tpu.dot_dimension_numbers<[1], [0], [0], [1], [0, 0, 1, 1], [], []>} : vector<8x128xbf16>, vector<128x128xbf16>, vector<8x128xf32> -> vector<8x128xf32>
    %114 = arith.addf %111, %113 : vector<8x128xf32>
    %cst_67 = arith.constant 0.000000e+00 : f32
    %115 = vector.broadcast %cst_67 : f32 to vector<8x128xf32>
    %116 = arith.maximumf %114, %115 : vector<8x128xf32>
    %c1_i32_68 = arith.constant 1 : i32
    %c8_i32_69 = arith.constant 8 : i32
    %117 = arith.muli %c1_i32_68, %c8_i32_69 : i32
    %118 = tpu.assume_multiple %117, 8 : i32
    %119 = arith.index_cast %118 : i32 to index
    %c0_70 = arith.constant 0 : index
    %120 = vector.load %arg11[%119, %c0_70] : memref<64x128xf32, #tpu.memory_space<vmem>>, vector<8x128xf32>
    %121 = arith.truncf %116 : vector<8x128xf32> to vector<8x128xbf16>
    %cst_71 = arith.constant dense<0.000000e+00> : vector<8x128xf32>
    %122 = tpu.matmul %121, %99, %cst_71 {dimension_numbers = #tpu.dot_dimension_numbers<[1], [0], [0], [1], [0, 0, 1, 1], [], []>} : vector<8x128xbf16>, vector<128x128xbf16>, vector<8x128xf32> -> vector<8x128xf32>
    %123 = arith.addf %120, %122 : vector<8x128xf32>
    %cst_72 = arith.constant 0.000000e+00 : f32
    %124 = vector.broadcast %cst_72 : f32 to vector<8x128xf32>
    %125 = arith.maximumf %123, %124 : vector<8x128xf32>
    %c2_i32_73 = arith.constant 2 : i32
    %c8_i32_74 = arith.constant 8 : i32
    %126 = arith.muli %c2_i32_73, %c8_i32_74 : i32
    %127 = tpu.assume_multiple %126, 8 : i32
    %128 = arith.index_cast %127 : i32 to index
    %c0_75 = arith.constant 0 : index
    %129 = vector.load %arg11[%128, %c0_75] : memref<64x128xf32, #tpu.memory_space<vmem>>, vector<8x128xf32>
    %130 = arith.truncf %125 : vector<8x128xf32> to vector<8x128xbf16>
    %cst_76 = arith.constant dense<0.000000e+00> : vector<8x128xf32>
    %131 = tpu.matmul %130, %99, %cst_76 {dimension_numbers = #tpu.dot_dimension_numbers<[1], [0], [0], [1], [0, 0, 1, 1], [], []>} : vector<8x128xbf16>, vector<128x128xbf16>, vector<8x128xf32> -> vector<8x128xf32>
    %132 = arith.addf %129, %131 : vector<8x128xf32>
    %cst_77 = arith.constant 0.000000e+00 : f32
    %133 = vector.broadcast %cst_77 : f32 to vector<8x128xf32>
    %134 = arith.maximumf %132, %133 : vector<8x128xf32>
    %c3_i32_78 = arith.constant 3 : i32
    %c8_i32_79 = arith.constant 8 : i32
    %135 = arith.muli %c3_i32_78, %c8_i32_79 : i32
    %136 = tpu.assume_multiple %135, 8 : i32
    %137 = arith.index_cast %136 : i32 to index
    %c0_80 = arith.constant 0 : index
    %138 = vector.load %arg11[%137, %c0_80] : memref<64x128xf32, #tpu.memory_space<vmem>>, vector<8x128xf32>
    %139 = arith.truncf %134 : vector<8x128xf32> to vector<8x128xbf16>
    %cst_81 = arith.constant dense<0.000000e+00> : vector<8x128xf32>
    %140 = tpu.matmul %139, %99, %cst_81 {dimension_numbers = #tpu.dot_dimension_numbers<[1], [0], [0], [1], [0, 0, 1, 1], [], []>} : vector<8x128xbf16>, vector<128x128xbf16>, vector<8x128xf32> -> vector<8x128xf32>
    %141 = arith.addf %138, %140 : vector<8x128xf32>
    %cst_82 = arith.constant 0.000000e+00 : f32
    %142 = vector.broadcast %cst_82 : f32 to vector<8x128xf32>
    %143 = arith.maximumf %141, %142 : vector<8x128xf32>
    %c4_i32_83 = arith.constant 4 : i32
    %c8_i32_84 = arith.constant 8 : i32
    %144 = arith.muli %c4_i32_83, %c8_i32_84 : i32
    %145 = tpu.assume_multiple %144, 8 : i32
    %146 = arith.index_cast %145 : i32 to index
    %c0_85 = arith.constant 0 : index
    %147 = vector.load %arg11[%146, %c0_85] : memref<64x128xf32, #tpu.memory_space<vmem>>, vector<8x128xf32>
    %148 = arith.truncf %143 : vector<8x128xf32> to vector<8x128xbf16>
    %cst_86 = arith.constant dense<0.000000e+00> : vector<8x128xf32>
    %149 = tpu.matmul %148, %99, %cst_86 {dimension_numbers = #tpu.dot_dimension_numbers<[1], [0], [0], [1], [0, 0, 1, 1], [], []>} : vector<8x128xbf16>, vector<128x128xbf16>, vector<8x128xf32> -> vector<8x128xf32>
    %150 = arith.addf %147, %149 : vector<8x128xf32>
    %cst_87 = arith.constant 0.000000e+00 : f32
    %151 = vector.broadcast %cst_87 : f32 to vector<8x128xf32>
    %152 = arith.maximumf %150, %151 : vector<8x128xf32>
    %c5_i32_88 = arith.constant 5 : i32
    %c8_i32_89 = arith.constant 8 : i32
    %153 = arith.muli %c5_i32_88, %c8_i32_89 : i32
    %154 = tpu.assume_multiple %153, 8 : i32
    %155 = arith.index_cast %154 : i32 to index
    %c0_90 = arith.constant 0 : index
    %156 = vector.load %arg11[%155, %c0_90] : memref<64x128xf32, #tpu.memory_space<vmem>>, vector<8x128xf32>
    %157 = arith.truncf %152 : vector<8x128xf32> to vector<8x128xbf16>
    %cst_91 = arith.constant dense<0.000000e+00> : vector<8x128xf32>
    %158 = tpu.matmul %157, %99, %cst_91 {dimension_numbers = #tpu.dot_dimension_numbers<[1], [0], [0], [1], [0, 0, 1, 1], [], []>} : vector<8x128xbf16>, vector<128x128xbf16>, vector<8x128xf32> -> vector<8x128xf32>
    %159 = arith.addf %156, %158 : vector<8x128xf32>
    %cst_92 = arith.constant 0.000000e+00 : f32
    %160 = vector.broadcast %cst_92 : f32 to vector<8x128xf32>
    %161 = arith.maximumf %159, %160 : vector<8x128xf32>
    %c6_i32_93 = arith.constant 6 : i32
    %c8_i32_94 = arith.constant 8 : i32
    %162 = arith.muli %c6_i32_93, %c8_i32_94 : i32
    %163 = tpu.assume_multiple %162, 8 : i32
    %164 = arith.index_cast %163 : i32 to index
    %c0_95 = arith.constant 0 : index
    %165 = vector.load %arg11[%164, %c0_95] : memref<64x128xf32, #tpu.memory_space<vmem>>, vector<8x128xf32>
    %166 = arith.truncf %161 : vector<8x128xf32> to vector<8x128xbf16>
    %cst_96 = arith.constant dense<0.000000e+00> : vector<8x128xf32>
    %167 = tpu.matmul %166, %99, %cst_96 {dimension_numbers = #tpu.dot_dimension_numbers<[1], [0], [0], [1], [0, 0, 1, 1], [], []>} : vector<8x128xbf16>, vector<128x128xbf16>, vector<8x128xf32> -> vector<8x128xf32>
    %168 = arith.addf %165, %167 : vector<8x128xf32>
    %cst_97 = arith.constant 0.000000e+00 : f32
    %169 = vector.broadcast %cst_97 : f32 to vector<8x128xf32>
    %170 = arith.maximumf %168, %169 : vector<8x128xf32>
    %c7_i32_98 = arith.constant 7 : i32
    %c8_i32_99 = arith.constant 8 : i32
    %171 = arith.muli %c7_i32_98, %c8_i32_99 : i32
    %172 = tpu.assume_multiple %171, 8 : i32
    %173 = arith.index_cast %172 : i32 to index
    %c0_100 = arith.constant 0 : index
    %174 = vector.load %arg11[%173, %c0_100] : memref<64x128xf32, #tpu.memory_space<vmem>>, vector<8x128xf32>
    %175 = arith.truncf %170 : vector<8x128xf32> to vector<8x128xbf16>
    %cst_101 = arith.constant dense<0.000000e+00> : vector<8x128xf32>
    %176 = tpu.matmul %175, %99, %cst_101 {dimension_numbers = #tpu.dot_dimension_numbers<[1], [0], [0], [1], [0, 0, 1, 1], [], []>} : vector<8x128xbf16>, vector<128x128xbf16>, vector<8x128xf32> -> vector<8x128xf32>
    %177 = arith.addf %174, %176 : vector<8x128xf32>
    %cst_102 = arith.constant 0.000000e+00 : f32
    %178 = vector.broadcast %cst_102 : f32 to vector<8x128xf32>
    %179 = arith.maximumf %177, %178 : vector<8x128xf32>
    %c8_i32_103 = arith.constant 8 : i32
    %180 = arith.truncf %179 : vector<8x128xf32> to vector<8x128xbf16>
    %c0_104 = arith.constant 0 : index
    %c0_105 = arith.constant 0 : index
    %181 = vector.load %arg8[%c0_104, %c0_105] : memref<128x128xbf16, #tpu.memory_space<vmem>>, vector<128x128xbf16>
    %cst_106 = arith.constant dense<0.000000e+00> : vector<8x128xf32>
    %182 = tpu.matmul %180, %181, %cst_106 {dimension_numbers = #tpu.dot_dimension_numbers<[1], [0], [0], [1], [0, 0, 1, 1], [], []>} : vector<8x128xbf16>, vector<128x128xbf16>, vector<8x128xf32> -> vector<8x128xf32>
    %c0_107 = arith.constant 0 : index
    %c0_108 = arith.constant 0 : index
    %183 = vector.load %arg9[%c0_107, %c0_108] : memref<1x128xf32, #tpu.memory_space<vmem>>, vector<1x128xf32>
    %184 = vector.broadcast %183 : vector<1x128xf32> to vector<8x128xf32>
    %185 = arith.addf %182, %184 : vector<8x128xf32>
    %c0_109 = arith.constant 0 : index
    %c0_110 = arith.constant 0 : index
    %186 = vector.load %arg10[%c0_109, %c0_110] : memref<8x128xf32, #tpu.memory_space<vmem>>, vector<8x128xf32>
    tpu.vector_store %arg10[%c0_109, %c0_110], %185 {strides = array<i32>} : memref<8x128xf32, #tpu.memory_space<vmem>>, vector<8x128xf32>,
    return
  }
  func.func @transform_0(%arg0: i32) -> (i32, i32, i32) {
    %c0_i32 = arith.constant 0 : i32
    %c0_i32_0 = arith.constant 0 : i32
    %c0_i32_1 = arith.constant 0 : i32
    return %arg0, %c0_i32, %c0_i32_0 : i32, i32, i32
  }
  func.func @transform_1(%arg0: i32) -> (i32, i32) {
    %c0_i32 = arith.constant 0 : i32
    %c0_i32_0 = arith.constant 0 : i32
    %c0_i32_1 = arith.constant 0 : i32
    return %c0_i32, %c0_i32_0 : i32, i32
  }
  func.func @transform_2(%arg0: i32) -> (i32, i32) {
    %c0_i32 = arith.constant 0 : i32
    %c0_i32_0 = arith.constant 0 : i32
    %c0_i32_1 = arith.constant 0 : i32
    return %c0_i32, %c0_i32_0 : i32, i32
  }
  func.func @transform_3(%arg0: i32) -> (i32, i32) {
    %c0_i32 = arith.constant 0 : i32
    %c0_i32_0 = arith.constant 0 : i32
    %c0_i32_1 = arith.constant 0 : i32
    return %c0_i32, %c0_i32_0 : i32, i32
  }
  func.func @transform_4(%arg0: i32) -> (i32, i32) {
    %c0_i32 = arith.constant 0 : i32
    %c0_i32_0 = arith.constant 0 : i32
    %c0_i32_1 = arith.constant 0 : i32
    return %c0_i32, %c0_i32_0 : i32, i32
  }
  func.func @transform_5(%arg0: i32) -> (i32, i32) {
    %c0_i32 = arith.constant 0 : i32
    %c0_i32_0 = arith.constant 0 : i32
    %c0_i32_1 = arith.constant 0 : i32
    return %c0_i32, %c0_i32_0 : i32, i32
  }
  func.func @transform_6(%arg0: i32) -> (i32, i32) {
    %c0_i32 = arith.constant 0 : i32
    %c0_i32_0 = arith.constant 0 : i32
    %c0_i32_1 = arith.constant 0 : i32
    return %c0_i32, %c0_i32_0 : i32, i32
  }
  func.func @transform_7(%arg0: i32) -> (i32, i32) {
    %c0_i32 = arith.constant 0 : i32
    %c0_i32_0 = arith.constant 0 : i32
    %c0_i32_1 = arith.constant 0 : i32
    return %c0_i32, %c0_i32_0 : i32, i32
  }
  func.func @transform_8(%arg0: i32) -> (i32, i32) {
    %c0_i32 = arith.constant 0 : i32
    %c0_i32_0 = arith.constant 0 : i32
    %c0_i32_1 = arith.constant 0 : i32
    return %c0_i32, %c0_i32_0 : i32, i32
  }
  func.func @transform_9(%arg0: i32) -> (i32, i32) {
    %c0_i32 = arith.constant 0 : i32
    %c0_i32_0 = arith.constant 0 : i32
    return %arg0, %c0_i32 : i32, i32
  }
}

</mosaic_0001>

<bundles_post_ra>
// kernel: tpu_custom_call.1
= control target key start
LH: loop header
LB: loop body
LE: loop exit
PB: predicated region body
PF: predicated region fallthrough
CT: control target
= control target key end

     0   :  { %14 = vsyncpa [#allocation4], 0  ;;  %s1569_s0 = inlined_call_operand.hbm [shape: bf16[1,64,128], index: 0, kind: input, shape index: {}]   ;;  %s1570_s1 = inlined_call_operand.hbm [shape: bf16[128,128], index: 1, kind: input, shape index: {}]   ;;  %s1571_s2 = inlined_call_operand.hbm [shape: bf16[128,128], index: 2, kind: input, shape index: {}]   ;;  %s1572_s3 = inlined_call_operand.vmem [shape: f32[1,128], index: 3, kind: input, shape index: {}]   ;;  %s1573_s4 = inlined_call_operand.hbm [shape: bf16[128,128], index: 4, kind: input, shape index: {}]   ;;  %s1574_s5 = inlined_call_operand.hbm [shape: bf16[128,128], index: 5, kind: input, shape index: {}]   ;;  %s1575_s6 = inlined_call_operand.vmem [shape: f32[1,128], index: 6, kind: input, shape index: {}]   ;;  %s1576_s7 = inlined_call_operand.hbm [shape: bf16[128,128], index: 7, kind: input, shape index: {}]   ;;  %s1577_s8 = inlined_call_operand.vmem [shape: f32[1,128], index: 8, kind: input, shape index: {}]   ;;  %s1578_s9 = inlined_call_operand.hbm [shape: f32[8,128], index: 9, kind: output, shape index: {}]  }
   0x1   :  { %15 = vsyncpa [#allocation7], 0 }
   0x2   :  { %16 = vsyncpa [#allocation10], 0 }
   0x3   :  { %17 = vsyncpa [#allocation13], 0 }
   0x4   :  { %18 = vsyncpa [#allocation5], 0  ;;  %s36_s11 = sshll.u32 %s1570_s1, 4  ;;  %s1309_s12 = smov [#allocation6]   ;;  %s37_s11 = int_to_ptr.hbm [resolvable:$true] %s36_s11 }
   0x5   :  { %s38_s13 = sshll.u32 %s1309_s12, 4  ;;  %s64_s16 = sshll.u32 %s1573_s4, 4  ;;  %s39_s13 = int_to_ptr.vmem [resolvable:$true] %s38_s13  ;;  %s65_s16 = int_to_ptr.hbm [resolvable:$true] %s64_s16 }
   0x6   :  { %s1310_s17 = smov 64   ;;  %s1311_s18 = smov 4  }
   0x7   :  { %44 = dma.hbm_to_vmem [thread:$0]  %s37_s11, 1024, %s39_s13, [#allocation7], %s1310_s17, %s1310_s17, %s1311_s18  }
   0x8   :  { %s1312_s19 = smov [#allocation9]   ;;  %s23_s1 = sshll.u32 %s1569_s0, 4  ;;  %s24_s1 = int_to_ptr.hbm [resolvable:$true] %s23_s1 }
   0x9   :  { %s66_s20 = sshll.u32 %s1312_s19, 4  ;;  %s49_s24 = sshll.u32 %s1571_s2, 4  ;;  %s67_s20 = int_to_ptr.vmem [resolvable:$true] %s66_s20  ;;  %s50_s24 = int_to_ptr.hbm [resolvable:$true] %s49_s24 }
   0xa   :  { %72 = dma.hbm_to_vmem [thread:$0]  %s65_s16, 1024, %s67_s20, [#allocation10], %s1310_s17, %s1310_s17, %s1311_s18  }
   0xb   :  { %s1313_s25 = smov [#allocation3]   ;;  %s1314_s27 = smov [#allocation8]  }
   0xc   :  { %s25_s26 = sshll.u32 %s1313_s25, 4  ;;  %s51_s0 = sshll.u32 %s1314_s27, 4  ;;  %s26_s26 = int_to_ptr.vmem [resolvable:$true] %s25_s26  ;;  %s52_s0 = int_to_ptr.vmem [resolvable:$true] %s51_s0 }
   0xd   :  { %31 = dma.hbm_to_vmem [thread:$0]  %s24_s1, 512, %s26_s26, [#allocation4], %s1310_s17, %s1310_s17, %s1311_s18  }
   0xe   :  { %s77_s30 = sshll.u32 %s1574_s5, 4  ;;  %s92_s11 = sshll.u32 %s1576_s7, 4  ;;  %s78_s30 = int_to_ptr.hbm [resolvable:$true] %s77_s30  ;;  %s93_s11 = int_to_ptr.hbm [resolvable:$true] %s92_s11 }
   0xf   :  { %57 = dma.hbm_to_vmem [thread:$0]  %s50_s24, 1024, %s52_s0, [#allocation7], %s1310_s17, %s1310_s17, %s1311_s18  }
  0x10   :  { %s1315_s12 = smov [#allocation11]   ;;  %s1316_s14 = smov [#allocation12]  }
  0x11   :  { %s79_s13 = sshll.u32 %s1315_s12, 4  ;;  %s94_s5 = sshll.u32 %s1316_s14, 4  ;;  %s80_s13 = int_to_ptr.vmem [resolvable:$true] %s79_s13  ;;  %s95_s5 = int_to_ptr.vmem [resolvable:$true] %s94_s5 }
  0x12   :  { %85 = dma.hbm_to_vmem [thread:$0]  %s78_s30, 1024, %s80_s13, [#allocation10], %s1310_s17, %s1310_s17, %s1311_s18  }
  0x13   :  { %100 = dma.hbm_to_vmem [thread:$0]  %s93_s11, 1024, %s95_s5, [#allocation13], %s1310_s17, %s1310_s17, %s1311_s18  }
  0x14   :  { %1299 = dma.done.wait [#allocation4], 512  }
  0x15   :  { %1300 = vsyncadd [#allocation4], 4294966784 }
  0x16   :  { %1301 = dma.done.wait [#allocation7], 2048  }
  0x17   :  { %1302 = vsyncadd [#allocation7], 4294965248 }
  0x18   :  { %1303 = dma.done.wait [#allocation10], 2048  }
  0x19   :  { %1304 = vsyncadd [#allocation10], 4294965248 }
  0x1a   :  { %1305 = dma.done.wait [#allocation13], 1024  }
  0x1b   :  { %1306 = vsyncadd [#allocation13], 4294966272  ;;  %v1081_v0 = vld [vmem:[#allocation6 + $0x38] sm:$0xff]  ;;  %v1080_v2 = vld [vmem:[#allocation6 + $0x30] sm:$0xff]  ;;  %v1317_v17 = vmov 0   ;;  %s1318_s18 = smov [#allocation14]  }
  0x1c   :  { %v1405_v1 = vld [vmem:[#allocation8 + $0x38] sm:$0xff]  ;;  %244 = vmatpush.bf16.msra.mxu0 %v1081_v0  ;;  %v1408_v3 = vld [vmem:[#allocation8 + $0x30] sm:$0xff]  ;;  %v1079_v4 = vld [vmem:[#allocation6 + $0x28] sm:$0xff]  ;;  %s883_s19 = sshll.u32 %s1318_s18, 4  ;;  %s885_s22 = sshll.u32 %s1578_s9, 4  ;;  %s884_s19 = int_to_ptr.vmem [resolvable:$true] %s883_s19  ;;  %s886_s22 = int_to_ptr.hbm [resolvable:$true] %s885_s22 }
  0x1d   :  { %330 = vmatpush.bf16.msra.mxu1 %v1405_v1  ;;  %349 = vmatpush.bf16.msra.mxu2 %v1405_v1  ;;  %v1413_v5 = vld [vmem:[#allocation8 + $0x28] sm:$0xff]  ;;  %v1078_v6 = vld [vmem:[#allocation6 + $0x20] sm:$0xff]  ;;  %v1077_v8 = vld [vmem:[#allocation6 + $0x18] sm:$0xff] }
  0x1e   :  { %368 = vmatpush.bf16.msra.mxu3 %v1405_v1  ;;  %v1418_v7 = vld [vmem:[#allocation8 + $0x20] sm:$0xff]  ;;  %v1423_v9 = vld [vmem:[#allocation8 + $0x18] sm:$0xff]  ;;  %v1076_v10 = vld [vmem:[#allocation6 + $0x10] sm:$0xff] }
  0x1f   :  { %v1084_v11 = vld [vmem:[#allocation8 + $0x10] sm:$0xff]  ;;  %v1075_v12 = vld [vmem:[#allocation6 + $0x8] sm:$0xff]  ;;  %v1074_v14 = vld [vmem:[#allocation6] sm:$0xff] }
  0x20   :  { %245 = vmatpush.bf16.msra.mxu0 %v1080_v2  ;;  %v1083_v13 = vld [vmem:[#allocation8 + $0x8] sm:$0xff]  ;;  %v1082_v15 = vld [vmem:[#allocation8] sm:$0xff]  ;;  %v1101_v34 = vld [vmem:[#allocation9 + $0x38] sm:$0xff] }
  0x21   :  { %331 = vmatpush.bf16.msra.mxu1 %v1408_v3  ;;  %350 = vmatpush.bf16.msra.mxu2 %v1408_v3  ;;  %v1090_v16 = vld [vmem:[#allocation3] sm:$0xff]  ;;  %v1091_v26 = vld [vmem:[#allocation3 + $0x8] sm:$0xff]  ;;  %v1100_v35 = vld [vmem:[#allocation9 + $0x30] sm:$0xff] }
  0x22   :  { %369 = vmatpush.bf16.msra.mxu3 %v1408_v3  ;;  %v1459_v18 = vld [vmem:[%s1572_s3] ss:$0 sm:$0xff]  ;;  %v1099_v43 = vld [vmem:[#allocation9 + $0x28] sm:$0xff]  ;;  %v1092_v44 = vld [vmem:[#allocation3 + $0x10] sm:$0xff] }
  0x23   :  { %v1098_v45 = vld [vmem:[#allocation9 + $0x20] sm:$0xff]  ;;  %v1097_v46 = vld [vmem:[#allocation9 + $0x18] sm:$0xff]  ;;  %v1096_v47 = vld [vmem:[#allocation9 + $0x10] sm:$0xff] }
  0x24   :  { %246 = vmatpush.bf16.msra.mxu0 %v1079_v4  ;;  %v1095_v48 = vld [vmem:[#allocation9 + $0x8] sm:$0xff]  ;;  %v1094_v49 = vld [vmem:[#allocation9] sm:$0xff]  ;;  %v1465_v59 = vld [vmem:[#allocation11 + $0x38] sm:$0xff] }
  0x25   :  { %332 = vmatpush.bf16.msra.mxu1 %v1413_v5  ;;  %351 = vmatpush.bf16.msra.mxu2 %v1413_v5  ;;  %v1468_v60 = vld [vmem:[#allocation11 + $0x30] sm:$0xff]  ;;  %v1477_v61 = vld [vmem:[#allocation11 + $0x28] sm:$0xff]  ;;  %v1483_v62 = vld [vmem:[#allocation11 + $0x20] sm:$0xff] }
  0x26   :  { %370 = vmatpush.bf16.msra.mxu3 %v1413_v5  ;;  %v1489_v63 = vld [vmem:[#allocation11 + $0x18] sm:$0xff]  ;;  %v1492_v0 = vld [vmem:[#allocation11 + $0x10] sm:$0xff]  ;;  %v1505_v2 = vld [vmem:[#allocation11] sm:$0xff] }
  0x28   :  { %247 = vmatpush.bf16.msra.mxu0 %v1078_v6 }
  0x29   :  { %333 = vmatpush.bf16.msra.mxu1 %v1418_v7  ;;  %352 = vmatpush.bf16.msra.mxu2 %v1418_v7 }
  0x2a   :  { %371 = vmatpush.bf16.msra.mxu3 %v1418_v7 }
  0x2c   :  { %248 = vmatpush.bf16.msra.mxu0 %v1077_v8 }
  0x2d   :  { %334 = vmatpush.bf16.msra.mxu1 %v1423_v9  ;;  %353 = vmatpush.bf16.msra.mxu2 %v1423_v9 }
  0x2e   :  { %372 = vmatpush.bf16.msra.mxu3 %v1423_v9 }
  0x30   :  { %249 = vmatpush.bf16.msra.mxu0 %v1076_v10  ;;  %v1093_v10 = vld [vmem:[#allocation3 + $0x18] sm:$0xff] }
  0x31   :  { %335 = vmatpush.bf16.msra.mxu1 %v1084_v11  ;;  %354 = vmatpush.bf16.msra.mxu2 %v1084_v11 }
  0x32   :  { %373 = vmatpush.bf16.msra.mxu3 %v1084_v11 }
  0x34   :  { %250 = vmatpush.bf16.msra.mxu0 %v1075_v12 }
  0x35   :  { %336 = vmatpush.bf16.msra.mxu1 %v1083_v13  ;;  %355 = vmatpush.bf16.msra.mxu2 %v1083_v13 }
  0x36   :  { %374 = vmatpush.bf16.msra.mxu3 %v1083_v13 }
  0x38   :  { %251 = vmatpush.bf16.msra.mxu0 %v1074_v14 }
  0x39   :  { %337 = vmatpush.bf16.msra.mxu1 %v1082_v15  ;;  %356 = vmatpush.bf16.msra.mxu2 %v1082_v15 }
  0x3a   :  { %375 = vmatpush.bf16.msra.mxu3 %v1082_v15 }
  0x3b   :  { %252 = vmatmul.bf16.vlgmr.msra.gmra.mxu0 %v1090_v16 }
  0x3c   :  { %338 = vmatmul.bf16.vlgmr.msra.gmra.mxu1 %v1317_v17  ;;  %444 = vmatpush.bf16.msrb.mxu0 %v1405_v1 }
  0x3d   :  { %387 = vmatpush.bf16.msrb.mxu1 %v1405_v1  ;;  %406 = vmatpush.bf16.msrb.mxu2 %v1405_v1 }
  0x3e   :  { %425 = vmatpush.bf16.msrb.mxu3 %v1405_v1 }
  0x40   :  { %445 = vmatpush.bf16.msrb.mxu0 %v1408_v3 }
  0x41   :  { %388 = vmatpush.bf16.msrb.mxu1 %v1408_v3  ;;  %407 = vmatpush.bf16.msrb.mxu2 %v1408_v3 }
  0x42   :  { %426 = vmatpush.bf16.msrb.mxu3 %v1408_v3 }
  0x44   :  { %446 = vmatpush.bf16.msrb.mxu0 %v1413_v5 }
  0x45   :  { %389 = vmatpush.bf16.msrb.mxu1 %v1413_v5  ;;  %408 = vmatpush.bf16.msrb.mxu2 %v1413_v5 }
  0x46   :  { %427 = vmatpush.bf16.msrb.mxu3 %v1413_v5 }
  0x48   :  { %447 = vmatpush.bf16.msrb.mxu0 %v1418_v7 }
  0x49   :  { %390 = vmatpush.bf16.msrb.mxu1 %v1418_v7  ;;  %409 = vmatpush.bf16.msrb.mxu2 %v1418_v7 }
  0x4a   :  { %428 = vmatpush.bf16.msrb.mxu3 %v1418_v7 }
  0x4b   :  { %257 = vmatmul.bf16.gmra.mxu0 %v1091_v26 }
  0x4c   :  { %448 = vmatpush.bf16.msrb.mxu0 %v1423_v9 }
  0x4d   :  { %391 = vmatpush.bf16.msrb.mxu1 %v1423_v9  ;;  %410 = vmatpush.bf16.msrb.mxu2 %v1423_v9 }
  0x4e   :  { %429 = vmatpush.bf16.msrb.mxu3 %v1423_v9 }
  0x50   :  { %449 = vmatpush.bf16.msrb.mxu0 %v1084_v11 }
  0x51   :  { %392 = vmatpush.bf16.msrb.mxu1 %v1084_v11  ;;  %411 = vmatpush.bf16.msrb.mxu2 %v1084_v11 }
  0x52   :  { %430 = vmatpush.bf16.msrb.mxu3 %v1084_v11 }
  0x54   :  { %450 = vmatpush.bf16.msrb.mxu0 %v1083_v13 }
  0x55   :  { %393 = vmatpush.bf16.msrb.mxu1 %v1083_v13  ;;  %412 = vmatpush.bf16.msrb.mxu2 %v1083_v13 }
  0x56   :  { %431 = vmatpush.bf16.msrb.mxu3 %v1083_v13 }
  0x58   :  { %451 = vmatpush.bf16.msrb.mxu0 %v1082_v15 }
  0x59   :  { %394 = vmatpush.bf16.msrb.mxu1 %v1082_v15  ;;  %413 = vmatpush.bf16.msrb.mxu2 %v1082_v15 }
  0x5a   :  { %432 = vmatpush.bf16.msrb.mxu3 %v1082_v15 }
  0x5b   :  { %262 = vmatmul.bf16.gmra.mxu0 %v1092_v44 }
  0x5c   :  { %678 = vmatpush.bf16.msra.mxu0 %v1465_v59 }
  0x5d   :  { %463 = vmatpush.bf16.msra.mxu1 %v1405_v1  ;;  %v1501_v1 = vld [vmem:[#allocation11 + $0x8] sm:$0xff] }
  0x60   :  { %679 = vmatpush.bf16.msra.mxu0 %v1468_v60 }
  0x61   :  { %464 = vmatpush.bf16.msra.mxu1 %v1408_v3 }
  0x64   :  { %680 = vmatpush.bf16.msra.mxu0 %v1477_v61 }
  0x65   :  { %465 = vmatpush.bf16.msra.mxu1 %v1413_v5 }
  0x68   :  { %681 = vmatpush.bf16.msra.mxu0 %v1483_v62 }
  0x69   :  { %466 = vmatpush.bf16.msra.mxu1 %v1418_v7 }
  0x6b   :  { %267 = vmatmul.bf16.gmra.mxu0 %v1093_v10 }
  0x6c   :  { %682 = vmatpush.bf16.msra.mxu0 %v1489_v63 }
  0x6d   :  { %467 = vmatpush.bf16.msra.mxu1 %v1423_v9 }
  0x70   :  { %683 = vmatpush.bf16.msra.mxu0 %v1492_v0 }
  0x71   :  { %468 = vmatpush.bf16.msra.mxu1 %v1084_v11 }
  0x74   :  { %684 = vmatpush.bf16.msra.mxu0 %v1501_v1 }
  0x75   :  { %469 = vmatpush.bf16.msra.mxu1 %v1083_v13 }
  0x78   :  { %685 = vmatpush.bf16.msra.mxu0 %v1505_v2 }
  0x79   :  { %470 = vmatpush.bf16.msra.mxu1 %v1082_v15 }
  0xb8   :  { %v253_v19 = vpop.f32.mrf.mxu0 }
  0xb9   :  { %v339_v20 = vpop.f32.mrf.mxu1  ;;  %v254_v21 = vadd.f32 %v1459_v18, %v253_v19 }
  0xbb   :  { %v343_v22 = vadd.f32 %v339_v20, %v254_v21  ;;  %v1536_v20 = vld [vmem:[%s1575_s6] ss:$0 sm:$0xff] }
  0xbd   :  { %v344_v23 = vmax.f32 %v343_v22, 0.0 }
  0xbf   :  { %v348_v24 = vpack.c.bf16 %v344_v23, %v344_v23 }
  0xc0   :  { %v255_v27 = vpop.f32.mrf.mxu0 }
  0xc1   :  { %v341_v25 = vpop.f32.mrf.mxu1  ;;  %357 = vmatmul.bf16.vlgmr.msra.gmra.mxu2 %v348_v24  ;;  %v256_v28 = vadd.f32 %v1459_v18, %v255_v27 }
  0xc2   :  { %575 = vmatpush.bf16.msra.mxu2 %v1101_v34 }
  0xc6   :  { %576 = vmatpush.bf16.msra.mxu2 %v1100_v35 }
  0xc8   :  { %v258_v36 = vpop.f32.mrf.mxu0 }
  0xc9   :  { %v259_v37 = vadd.f32 %v1459_v18, %v258_v36 }
  0xca   :  { %577 = vmatpush.bf16.msra.mxu2 %v1099_v43 }
  0xce   :  { %578 = vmatpush.bf16.msra.mxu2 %v1098_v45 }
  0xd0   :  { %v260_v50 = vpop.f32.mrf.mxu0 }
  0xd1   :  { %v261_v51 = vadd.f32 %v1459_v18, %v260_v50 }
  0xd2   :  { %579 = vmatpush.bf16.msra.mxu2 %v1097_v46 }
  0xd6   :  { %580 = vmatpush.bf16.msra.mxu2 %v1096_v47 }
  0xd8   :  { %v263_v3 = vpop.f32.mrf.mxu0 }
  0xd9   :  { %v264_v4 = vadd.f32 %v1459_v18, %v263_v3 }
  0xda   :  { %581 = vmatpush.bf16.msra.mxu2 %v1095_v48 }
  0xde   :  { %582 = vmatpush.bf16.msra.mxu2 %v1094_v49 }
  0xe0   :  { %v265_v11 = vpop.f32.mrf.mxu0 }
  0xe1   :  { %v266_v12 = vadd.f32 %v1459_v18, %v265_v11 }
 0x144   :  { %v358_v29 = vpop.f32.mrf.mxu2 }
 0x145   :  { %v362_v30 = vadd.f32 %v358_v29, %v256_v28  ;;  %v268_v28 = vpop.f32.mrf.mxu0 }
 0x147   :  { %v363_v31 = vmax.f32 %v362_v30, 0.0  ;;  %v269_v30 = vadd.f32 %v1459_v18, %v268_v28  ;;  %v1111_v28 = vld [vmem:[#allocation12 + $0x8] sm:$0xff] }
 0x149   :  { %v367_v32 = vpack.c.bf16 %v363_v31, %v363_v31  ;;  %v520_v57 = vpack.c.bf16 %v363_v31, %v344_v23 }
 0x14b   :  { %376 = vmatmul.bf16.vlgmr.msra.gmra.mxu3 %v367_v32 }
 0x14c   :  { %v360_v33 = vpop.f32.mrf.mxu2  ;;  %661 = vmatpush.bf16.msra.mxu3 %v1465_v59 }
 0x14d   :  { %v270_v29 = vpop.f32.mrf.mxu0 }
 0x14e   :  { %v271_v43 = vadd.f32 %v1459_v18, %v270_v29  ;;  %v1110_v29 = vld [vmem:[#allocation12] sm:$0xff] }
 0x150   :  { %662 = vmatpush.bf16.msra.mxu3 %v1468_v60 }
 0x154   :  { %663 = vmatpush.bf16.msra.mxu3 %v1477_v61 }
 0x158   :  { %664 = vmatpush.bf16.msra.mxu3 %v1483_v62 }
 0x15c   :  { %665 = vmatpush.bf16.msra.mxu3 %v1489_v63 }
 0x160   :  { %666 = vmatpush.bf16.msra.mxu3 %v1492_v0 }
 0x164   :  { %667 = vmatpush.bf16.msra.mxu3 %v1501_v1 }
 0x168   :  { %668 = vmatpush.bf16.msra.mxu3 %v1505_v2 }
 0x1ce   :  { %v377_v38 = vpop.f32.mrf.mxu3 }
 0x1cf   :  { %v381_v39 = vadd.f32 %v377_v38, %v259_v37 }
 0x1d1   :  { %v382_v40 = vmax.f32 %v381_v39, 0.0 }
 0x1d3   :  { %v386_v41 = vpack.c.bf16 %v382_v40, %v382_v40 }
 0x1d5   :  { %395 = vmatmul.bf16.vlgmr.msrb.gmra.mxu1 %v386_v41 }
 0x1d6   :  { %v379_v42 = vpop.f32.mrf.mxu3  ;;  %695 = vmatpush.bf16.msrb.mxu1 %v1465_v59 }
 0x1da   :  { %696 = vmatpush.bf16.msrb.mxu1 %v1468_v60 }
 0x1de   :  { %697 = vmatpush.bf16.msrb.mxu1 %v1477_v61 }
 0x1e2   :  { %698 = vmatpush.bf16.msrb.mxu1 %v1483_v62 }
 0x1e6   :  { %699 = vmatpush.bf16.msrb.mxu1 %v1489_v63 }
 0x1ea   :  { %700 = vmatpush.bf16.msrb.mxu1 %v1492_v0 }
 0x1ee   :  { %701 = vmatpush.bf16.msrb.mxu1 %v1501_v1 }
 0x1f2   :  { %702 = vmatpush.bf16.msrb.mxu1 %v1505_v2 }
 0x252   :  { %v396_v52 = vpop.f32.mrf.mxu1 }
 0x253   :  { %v400_v53 = vadd.f32 %v396_v52, %v261_v51 }
 0x255   :  { %v401_v54 = vmax.f32 %v400_v53, 0.0 }
 0x257   :  { %v405_v55 = vpack.c.bf16 %v401_v54, %v401_v54  ;;  %v521_v58 = vpack.c.bf16 %v401_v54, %v382_v40 }
 0x259   :  { %414 = vmatmul.bf16.vlgmr.msrb.gmra.mxu2 %v405_v55 }
 0x25a   :  { %v398_v56 = vpop.f32.mrf.mxu1  ;;  %763 = vmatpush.bf16.msrb.mxu2 %v1465_v59 }
 0x25e   :  { %764 = vmatpush.bf16.msrb.mxu2 %v1468_v60 }
 0x262   :  { %765 = vmatpush.bf16.msrb.mxu2 %v1477_v61 }
 0x266   :  { %766 = vmatpush.bf16.msrb.mxu2 %v1483_v62 }
 0x269   :  { %583 = vmatmul.bf16.vlgmr.msra.gmra.mxu2 %v520_v57 }
 0x26a   :  { %767 = vmatpush.bf16.msrb.mxu2 %v1489_v63 }
 0x26e   :  { %768 = vmatpush.bf16.msrb.mxu2 %v1492_v0 }
 0x272   :  { %769 = vmatpush.bf16.msrb.mxu2 %v1501_v1 }
 0x276   :  { %770 = vmatpush.bf16.msrb.mxu2 %v1505_v2 }
 0x279   :  { %588 = vmatmul.bf16.gmra.mxu2 %v521_v58 }
 0x2dc   :  { %v415_v5 = vpop.f32.mrf.mxu2 }
 0x2dd   :  { %v419_v6 = vadd.f32 %v415_v5, %v264_v4 }
 0x2df   :  { %v420_v7 = vmax.f32 %v419_v6, 0.0 }
 0x2e1   :  { %v424_v8 = vpack.c.bf16 %v420_v7, %v420_v7 }
 0x2e3   :  { %433 = vmatmul.bf16.vlgmr.msrb.gmra.mxu3 %v424_v8 }
 0x2e4   :  { %v417_v9 = vpop.f32.mrf.mxu2  ;;  %712 = vmatpush.bf16.msrb.mxu3 %v1465_v59 }
 0x2e8   :  { %713 = vmatpush.bf16.msrb.mxu3 %v1468_v60 }
 0x2ec   :  { %714 = vmatpush.bf16.msrb.mxu3 %v1477_v61  ;;  %v584_v21 = vpop.f32.mrf.mxu2 }
 0x2ed   :  { %v585_v22 = vadd.f32 %v1536_v20, %v584_v21  ;;  %v1112_v21 = vld [vmem:[#allocation12 + $0x10] sm:$0xff] }
 0x2f0   :  { %715 = vmatpush.bf16.msrb.mxu3 %v1483_v62 }
 0x2f3   :  { %669 = vmatmul.bf16.vlgmr.msra.gmra.mxu3 %v1317_v17 }
 0x2f4   :  { %716 = vmatpush.bf16.msrb.mxu3 %v1489_v63  ;;  %v586_v36 = vpop.f32.mrf.mxu2 }
 0x2f5   :  { %v587_v37 = vadd.f32 %v1536_v20, %v586_v36  ;;  %v1130_v36 = vld [vmem:[%s1577_s8] ss:$0 sm:$0xff] }
 0x2f8   :  { %717 = vmatpush.bf16.msrb.mxu3 %v1492_v0 }
 0x2fc   :  { %718 = vmatpush.bf16.msrb.mxu3 %v1501_v1  ;;  %v589_v49 = vpop.f32.mrf.mxu2 }
 0x2fd   :  { %v590_v50 = vadd.f32 %v1536_v20, %v589_v49 }
 0x300   :  { %719 = vmatpush.bf16.msrb.mxu3 %v1505_v2 }
 0x304   :  { %780 = vmatpush.bf16.msra.mxu3 %v1465_v59  ;;  %v591_v56 = vpop.f32.mrf.mxu2 }
 0x305   :  { %v592_v57 = vadd.f32 %v1536_v20, %v591_v56 }
 0x308   :  { %781 = vmatpush.bf16.msra.mxu3 %v1468_v60 }
 0x30c   :  { %782 = vmatpush.bf16.msra.mxu3 %v1477_v61 }
 0x310   :  { %783 = vmatpush.bf16.msra.mxu3 %v1483_v62 }
 0x314   :  { %784 = vmatpush.bf16.msra.mxu3 %v1489_v63 }
 0x318   :  { %785 = vmatpush.bf16.msra.mxu3 %v1492_v0 }
 0x31c   :  { %786 = vmatpush.bf16.msra.mxu3 %v1501_v1 }
 0x320   :  { %787 = vmatpush.bf16.msra.mxu3 %v1505_v2 }
 0x366   :  { %v434_v13 = vpop.f32.mrf.mxu3 }
 0x367   :  { %v438_v14 = vadd.f32 %v434_v13, %v266_v12  ;;  %v1117_v12 = vld [vmem:[#allocation12 + $0x38] sm:$0xff]  ;;  %v1116_v13 = vld [vmem:[#allocation12 + $0x30] sm:$0xff] }
 0x369   :  { %v439_v15 = vmax.f32 %v438_v14, 0.0 }
 0x36b   :  { %v443_v16 = vpack.c.bf16 %v439_v15, %v439_v15  ;;  %v522_v17 = vpack.c.bf16 %v439_v15, %v420_v7  ;;  %v1115_v15 = vld [vmem:[#allocation12 + $0x28] sm:$0xff] }
 0x36d   :  { %452 = vmatmul.bf16.vlgmr.msrb.gmra.mxu0 %v443_v16  ;;  %593 = vmatmul.bf16.gmra.mxu2 %v522_v17  ;;  %v1114_v16 = vld [vmem:[#allocation12 + $0x20] sm:$0xff]  ;;  %v1113_v17 = vld [vmem:[#allocation12 + $0x18] sm:$0xff] }
 0x36e   :  { %v436_v19 = vpop.f32.mrf.mxu3  ;;  %729 = vmatpush.bf16.msrb.mxu0 %v1465_v59 }
 0x372   :  { %730 = vmatpush.bf16.msrb.mxu0 %v1468_v60 }
 0x376   :  { %v670_v23 = vpop.f32.mrf.mxu3  ;;  %731 = vmatpush.bf16.msrb.mxu0 %v1477_v61 }
 0x377   :  { %v674_v24 = vadd.f32 %v670_v23, %v585_v22 }
 0x379   :  { %v675_v25 = vmax.f32 %v674_v24, 0.0 }
 0x37a   :  { %732 = vmatpush.bf16.msrb.mxu0 %v1483_v62 }
 0x37b   :  { %v677_v26 = vpack.c.bf16 %v675_v25, %v675_v25 }
 0x37d   :  { %686 = vmatmul.bf16.vlgmr.msra.gmra.mxu0 %v677_v26 }
 0x37e   :  { %v672_v27 = vpop.f32.mrf.mxu3  ;;  %733 = vmatpush.bf16.msrb.mxu0 %v1489_v63 }
 0x382   :  { %734 = vmatpush.bf16.msrb.mxu0 %v1492_v0 }
 0x386   :  { %735 = vmatpush.bf16.msrb.mxu0 %v1501_v1 }
 0x38a   :  { %736 = vmatpush.bf16.msrb.mxu0 %v1505_v2 }
 0x38e   :  { %864 = vmatpush.bf16.msra.mxu0 %v1117_v12 }
 0x392   :  { %865 = vmatpush.bf16.msra.mxu0 %v1116_v13 }
 0x396   :  { %866 = vmatpush.bf16.msra.mxu0 %v1115_v15 }
 0x39a   :  { %867 = vmatpush.bf16.msra.mxu0 %v1114_v16 }
 0x39e   :  { %868 = vmatpush.bf16.msra.mxu0 %v1113_v17 }
 0x3a2   :  { %869 = vmatpush.bf16.msra.mxu0 %v1112_v21 }
 0x3a6   :  { %870 = vmatpush.bf16.msra.mxu0 %v1111_v28 }
 0x3aa   :  { %871 = vmatpush.bf16.msra.mxu0 %v1110_v29 }
 0x3ea   :  { %v453_v31 = vpop.f32.mrf.mxu0 }
 0x3eb   :  { %v457_v32 = vadd.f32 %v453_v31, %v269_v30 }
 0x3ed   :  { %v458_v33 = vmax.f32 %v457_v32, 0.0 }
 0x3ef   :  { %v462_v34 = vpack.c.bf16 %v458_v33, %v458_v33 }
 0x3f1   :  { %471 = vmatmul.bf16.vlgmr.msra.gmra.mxu1 %v462_v34 }
 0x3f2   :  { %v455_v35 = vpop.f32.mrf.mxu0  ;;  %746 = vmatpush.bf16.msra.mxu1 %v1465_v59 }
 0x3f6   :  { %747 = vmatpush.bf16.msra.mxu1 %v1468_v60 }
 0x3fa   :  { %v687_v38 = vpop.f32.mrf.mxu0  ;;  %748 = vmatpush.bf16.msra.mxu1 %v1477_v61 }
 0x3fb   :  { %v691_v39 = vadd.f32 %v687_v38, %v587_v37 }
 0x3fd   :  { %v692_v40 = vmax.f32 %v691_v39, 0.0 }
 0x3fe   :  { %749 = vmatpush.bf16.msra.mxu1 %v1483_v62  ;;  %v594_v62 = vpop.f32.mrf.mxu2 }
 0x3ff   :  { %v694_v41 = vpack.c.bf16 %v692_v40, %v692_v40 }
 0x401   :  { %703 = vmatmul.bf16.vlgmr.msrb.gmra.mxu1 %v694_v41 }
 0x402   :  { %v689_v42 = vpop.f32.mrf.mxu0  ;;  %750 = vmatpush.bf16.msra.mxu1 %v1489_v63  ;;  %v595_v63 = vadd.f32 %v1536_v20, %v594_v62 }
 0x406   :  { %751 = vmatpush.bf16.msra.mxu1 %v1492_v0  ;;  %v596_v5 = vpop.f32.mrf.mxu2 }
 0x407   :  { %v597_v6 = vadd.f32 %v1536_v20, %v596_v5 }
 0x40a   :  { %752 = vmatpush.bf16.msra.mxu1 %v1501_v1 }
 0x40e   :  { %753 = vmatpush.bf16.msra.mxu1 %v1505_v2 }
 0x46e   :  { %v472_v44 = vpop.f32.mrf.mxu1 }
 0x46f   :  { %v476_v45 = vadd.f32 %v472_v44, %v271_v43 }
 0x471   :  { %v477_v46 = vmax.f32 %v476_v45, 0.0 }
 0x473   :  { %v523_v47 = vpack.c.bf16 %v477_v46, %v458_v33 }
 0x475   :  { %598 = vmatmul.bf16.gmra.mxu2 %v523_v47 }
 0x476   :  { %v474_v48 = vpop.f32.mrf.mxu1 }
 0x47e   :  { %v704_v51 = vpop.f32.mrf.mxu1 }
 0x47f   :  { %v708_v52 = vadd.f32 %v704_v51, %v590_v50 }
 0x481   :  { %v709_v53 = vmax.f32 %v708_v52, 0.0 }
 0x483   :  { %v711_v54 = vpack.c.bf16 %v709_v53, %v709_v53 }
 0x485   :  { %720 = vmatmul.bf16.vlgmr.msrb.gmra.mxu3 %v711_v54 }
 0x486   :  { %v706_v55 = vpop.f32.mrf.mxu1 }
 0x4f8   :  { %v599_v14 = vpop.f32.mrf.mxu2 }
 0x4f9   :  { %v600_v22 = vadd.f32 %v1536_v20, %v599_v14 }
 0x500   :  { %v601_v19 = vpop.f32.mrf.mxu2 }
 0x501   :  { %v602_v30 = vadd.f32 %v1536_v20, %v601_v19 }
 0x508   :  { %v721_v58 = vpop.f32.mrf.mxu3 }
 0x509   :  { %v725_v18 = vadd.f32 %v721_v58, %v592_v57 }
 0x50b   :  { %v726_v59 = vmax.f32 %v725_v18, 0.0 }
 0x50d   :  { %v728_v60 = vpack.c.bf16 %v726_v59, %v726_v59 }
 0x50f   :  { %737 = vmatmul.bf16.vlgmr.msrb.gmra.mxu0 %v728_v60 }
 0x510   :  { %v723_v61 = vpop.f32.mrf.mxu3 }
 0x58c   :  { %v738_v0 = vpop.f32.mrf.mxu0 }
 0x58d   :  { %v742_v1 = vadd.f32 %v738_v0, %v595_v63 }
 0x58f   :  { %v743_v2 = vmax.f32 %v742_v1, 0.0 }
 0x591   :  { %v745_v3 = vpack.c.bf16 %v743_v2, %v743_v2 }
 0x593   :  { %754 = vmatmul.bf16.vlgmr.msra.gmra.mxu1 %v745_v3 }
 0x594   :  { %v740_v4 = vpop.f32.mrf.mxu0 }
 0x610   :  { %v755_v7 = vpop.f32.mrf.mxu1 }
 0x611   :  { %v759_v8 = vadd.f32 %v755_v7, %v597_v6 }
 0x613   :  { %v760_v9 = vmax.f32 %v759_v8, 0.0 }
 0x615   :  { %v762_v10 = vpack.c.bf16 %v760_v9, %v760_v9 }
 0x617   :  { %771 = vmatmul.bf16.vlgmr.msrb.gmra.mxu2 %v762_v10 }
 0x618   :  { %v757_v11 = vpop.f32.mrf.mxu1 }
 0x69a   :  { %v772_v23 = vpop.f32.mrf.mxu2 }
 0x69b   :  { %v776_v24 = vadd.f32 %v772_v23, %v600_v22 }
 0x69d   :  { %v777_v25 = vmax.f32 %v776_v24, 0.0 }
 0x69f   :  { %v779_v26 = vpack.c.bf16 %v777_v25, %v777_v25 }
 0x6a1   :  { %788 = vmatmul.bf16.vlgmr.msra.gmra.mxu3 %v779_v26 }
 0x6a2   :  { %v774_v27 = vpop.f32.mrf.mxu2 }
 0x724   :  { %v789_v31 = vpop.f32.mrf.mxu3 }
 0x725   :  { %v793_v32 = vadd.f32 %v789_v31, %v602_v30 }
 0x727   :  { %v794_v33 = vmax.f32 %v793_v32, 0.0 }
 0x729   :  { %v795_v34 = vpack.c.bf16 %v794_v33, %v794_v33 }
 0x72b   :  { %872 = vmatmul.bf16.vlgmr.msra.gmra.mxu0 %v795_v34 }
 0x72c   :  { %v791_v35 = vpop.f32.mrf.mxu3 }
 0x7a8   :  { %v873_v37 = vpop.f32.mrf.mxu0 }
 0x7a9   :  { %v874_v38 = vadd.f32 %v1130_v36, %v873_v37 }
 0x7ab   :  { %877 = vst [vmem:[#allocation14] sm:$0xff] %v874_v38 }
 0x7ac   :  { %888 = dma.vmem_to_hbm [thread:$0]  %s884_s19, 128, %s886_s22, [#allocation5]  }
 0x7b0   :  { %v875_v20 = vpop.f32.mrf.mxu0 }
 0x7b1   :  { %1307 = dma.done.wait [#allocation5], 128  }
 0x7b2   :  { %1308 = vsyncadd [#allocation5], 4294967168 }
 0x7b3   :  { %893 = vsyncpa [#allocation4], 1 }
 0x7b4   :  { %894 = vsyncpa [#allocation7], 1 }
 0x7b5   :  { %895 = vsyncpa [#allocation10], 1 }
 0x7b6   :  { %896 = vsyncpa [#allocation13], 1 }
 0x7b7   :  { %897 = vsyncpa [#allocation5], 1 }

</bundles_post_ra>
